<compile_context>
chip_gen: v7x
topology: tpu7x:2x2x1
jax: 0.10.0
libtpu: 0.0.40
codegen_flags: <defaults>
</compile_context>

<pallas_src>
import jax
import jax.numpy as jnp
from jax.experimental import pallas as pl
from jax.experimental.pallas import tpu as pltpu


def _round_up(v, m):
    return (v + m - 1) // m * m


def _vmem_capacity_bytes():
    # v7x has only 64 MiB VMEM per TensorCore (v5e/v6e: 128 MiB); derive the
    # cap from the device, with a conservative fallback.
    try:
        cap = getattr(pltpu.get_tpu_info(), "vmem_capacity_bytes", None)
        if cap:
            return int(cap)
    except Exception:
        pass
    return 64 << 20


# ----------------------------------------------------------------------------
# Kernel 1: tiled global-average-pool (sum) reduction over the spatial axis.
#
# Layout: inputs flattened to (B*C, H*W); rows ride sublanes, spatial rides
# lanes (lane-dense DMA even for tiny C).  Grid = (spatial split, row blocks,
# spatial chunks); the innermost spatial axis is the reduction ("arbitrary"),
# the two leading axes are "parallel".  Each (n_split, rows, 128) output slab
# holds f32 lane-partial sums and is resident across the reduction axis.
# ----------------------------------------------------------------------------
def _make_pool_kernel(n_in, width, tile_s, n_s_sub):
    n_chunks = tile_s // 128
    need_mask = (width % tile_s) != 0    # only the last spatial block is ragged

    def kernel(*refs):
        in_refs, acc_refs = refs[:n_in], refs[n_in:]
        s = pl.program_id(2)

        @pl.when(s == 0)
        def _():
            for acc_ref in acc_refs:
                acc_ref[...] = jnp.zeros_like(acc_ref)

        if need_mask:
            # Out-of-bounds lanes of a partial edge block hold undefined data;
            # zero them before accumulating (VPU work, free under HBM-bound).
            lane = jax.lax.broadcasted_iota(jnp.int32, acc_refs[0].shape, 1)
            base = (pl.program_id(0) * n_s_sub + s) * tile_s

        # Inputs are processed one after the other so only one resident
        # accumulator plus one 128-lane chunk is live at a time (no spills).
        for x_ref, acc_ref in zip(in_refs, acc_refs):
            acc = acc_ref[...]
            for j in range(n_chunks):
                # Per-chunk load + cast: never materialize the whole f32 tile.
                chunk = x_ref[:, j * 128:(j + 1) * 128].astype(jnp.float32)
                if need_mask:
                    chunk = jnp.where(base + (j * 128) + lane < width, chunk, 0.0)
                acc = acc + chunk
            acc_ref[...] = acc

    return kernel


def _pool_lane_partials(inputs, *, row_tile=128, spatial_tile=4096):
    """inputs: list of same-shape (rows, width) arrays in their native dtype.

    Returns one (n_split, rows, 128) f32 lane-partial-sum slab per input;
    sum over axes (0, 2) and scale by 1/width to get the per-row mean.
    """
    rows, width = inputs[0].shape
    itemsize = max(jnp.dtype(a.dtype).itemsize for a in inputs)
    n_in = len(inputs)

    sub = {1: 32, 2: 16}.get(itemsize, 8)               # dtype-native sublanes
    tile_s = min(_round_up(width, 128), spatial_tile)   # full width if it fits
    tile_r = min(_round_up(rows, sub), row_tile)        # acc <= 16 vregs
    n_r = pl.cdiv(rows, tile_r)
    n_s = pl.cdiv(width, tile_s)

    # v7x has 2 TensorCores: when the row axis has a single block, split the
    # reduction axis into two "parallel" halves (each writes its own partial
    # slab; they are combined in the JAX epilogue).
    if n_r == 1 and n_s >= 4 and n_s % 2 == 0:
        n_split, n_s_sub = 2, n_s // 2
    else:
        n_split, n_s_sub = 1, n_s

    # Tile-derived VMEM budget with headroom, capped by the device capacity.
    in_bytes = n_in * 2 * tile_r * tile_s * itemsize      # double-buffered inputs
    out_bytes = n_in * 2 * tile_r * 128 * 4
    vmem_limit = int(min(int(0.45 * _vmem_capacity_bytes()),
                         max(16 << 20, 3 * (in_bytes + out_bytes))))

    kernel = _make_pool_kernel(n_in, width, tile_s, n_s_sub)
    in_specs = [pl.BlockSpec((tile_r, tile_s), lambda p, r, s: (r, p * n_s_sub + s))
                for _ in range(n_in)]
    out_specs = tuple(pl.BlockSpec((None, tile_r, 128), lambda p, r, s: (p, r, 0))
                      for _ in range(n_in))
    out_shape = tuple(jax.ShapeDtypeStruct((n_split, rows, 128), jnp.float32)
                      for _ in range(n_in))

    parts = pl.pallas_call(
        kernel,
        out_shape=out_shape,
        grid=(n_split, n_r, n_s_sub),
        in_specs=in_specs,
        out_specs=out_specs,
        compiler_params=pltpu.CompilerParams(
            dimension_semantics=("parallel", "parallel", "arbitrary"),
            vmem_limit_bytes=vmem_limit,
        ),
        cost_estimate=pl.CostEstimate(
            flops=n_in * rows * width,
            transcendentals=0,
            bytes_accessed=sum(rows * width * jnp.dtype(a.dtype).itemsize
                               for a in inputs) + n_in * n_split * rows * 128 * 4,
        ),
    )(*inputs)
    if not isinstance(parts, (tuple, list)):
        parts = (parts,)
    return tuple(parts)


# ----------------------------------------------------------------------------
# Kernel 2: the tiny SE MLP (Linear -> ReLU -> Linear(+bias) -> Sigmoid).
# ----------------------------------------------------------------------------
def _se_mlp_kernel(xp_ref, ep_ref, w1x_ref, w1e_ref, w2_ref, b2_ref, gate_ref):
    # cat([x_pool, e_pool], dim=1) @ W1  ==  x_pool @ W1[:C] + e_pool @ W1[C:]
    h = (jnp.dot(xp_ref[...], w1x_ref[...].astype(jnp.float32),
                 preferred_element_type=jnp.float32)
         + jnp.dot(ep_ref[...], w1e_ref[...].astype(jnp.float32),
                   preferred_element_type=jnp.float32))
    h = jnp.maximum(h, 0.0)                                        # ReLU
    g = (jnp.dot(h, w2_ref[...].astype(jnp.float32),
                 preferred_element_type=jnp.float32)
         + b2_ref[...].astype(jnp.float32))
    gate_ref[...] = jax.nn.sigmoid(g)                              # Sigmoid


def _se_mlp(x_pool, e_pool, w1, w2, b2):
    B, C = x_pool.shape
    # Weights stay in their native dtype (no wrapper up-cast / extra HBM
    # copies); any needed cast happens in-kernel.
    w1x = w1[:C, :]          # (C, out_ch)
    w1e = w1[C:, :]          # (C, out_ch)
    b2_2d = b2.reshape(1, C)
    return pl.pallas_call(
        _se_mlp_kernel,
        out_shape=jax.ShapeDtypeStruct((B, C), jnp.float32),
        in_specs=[
            pl.BlockSpec(x_pool.shape, lambda: (0, 0)),
            pl.BlockSpec(e_pool.shape, lambda: (0, 0)),
            pl.BlockSpec(w1x.shape, lambda: (0, 0)),
            pl.BlockSpec(w1e.shape, lambda: (0, 0)),
            pl.BlockSpec(w2.shape, lambda: (0, 0)),
            pl.BlockSpec(b2_2d.shape, lambda: (0, 0)),
        ],
        out_specs=pl.BlockSpec((B, C), lambda: (0, 0)),
    )(x_pool, e_pool, w1x, w1e, w2, b2_2d)


# ----------------------------------------------------------------------------
# Module forward.
# ----------------------------------------------------------------------------
def secat_forward(x, extractor, w1, w2, b2):
    """SECat forward.

    x, extractor: (B, C, H, W) NCHW (spatial sizes may differ).
    w1: (2C, out_ch)   Linear(2C -> out_ch, bias=False), stored transposed.
    w2: (out_ch, C), b2: (C,).
    Returns the sigmoid gate broadcast to x.shape, in x.dtype (module parity).
    """
    B, C = x.shape[0], x.shape[1]
    hw_x = x.shape[2] * x.shape[3]
    hw_e = extractor.shape[2] * extractor.shape[3]

    x2 = x.reshape(B * C, hw_x)            # free reshape (contiguous NCHW)
    e2 = extractor.reshape(B * C, hw_e)

    if hw_x == hw_e and x2.dtype == e2.dtype:
        # Same spatial size: pool both tensors in a single pallas_call.
        x_part, e_part = _pool_lane_partials([x2, e2])
    else:
        (x_part,) = _pool_lane_partials([x2])
        (e_part,) = _pool_lane_partials([e2])

    # Tiny epilogue in plain JAX: combine split slabs + cross-lane reduce +
    # 1/(H*W) scale on (<=2, B*C, 128) f32 data.
    # TODO(synk): could be folded into the MLP kernel (expanded-weight MXU
    # contraction) to shave a couple of tiny dispatches in the latency tail.
    x_pool = (x_part.sum(axis=(0, 2)) * (1.0 / hw_x)).reshape(B, C)
    e_pool = (e_part.sum(axis=(0, 2)) * (1.0 / hw_e)).reshape(B, C)

    gate = _se_mlp(x_pool, e_pool, w1, w2, b2).astype(x.dtype)     # (B, C)

    # h.view(B, C, 1, 1).expand_as(x): kept only for module output parity.
    # TODO(synk): consumers should take `gate` (B, C) directly (or fuse the
    # elementwise x * gate) instead of materializing the full-size broadcast.
    return jnp.broadcast_to(gate[:, :, None, None], x.shape)


def secat_reference(x, extractor, w1, w2, b2):
    """Pure-JAX reference matching the PyTorch forward exactly."""
    xp = jnp.mean(x, axis=(2, 3))
    ep = jnp.mean(extractor, axis=(2, 3))
    cat = jnp.concatenate([xp, ep], axis=1)            # (B, 2C)
    h = jnp.maximum(cat @ w1, 0.0)                     # Linear(2C->out)+ReLU
    g = jax.nn.sigmoid(h @ w2 + b2)                    # Linear(out->C)+Sigmoid
    return jnp.broadcast_to(g[:, :, None, None], x.shape)


def _make_params(key, C, out_ch):
    kw1, kw2, kb2 = jax.random.split(key, 3)
    # PyTorch Linear weight is (out, in); we store the transposed (in, out)
    # layout so y = x @ W directly.
    w1 = 0.1 * jax.random.normal(kw1, (2 * C, out_ch), dtype=jnp.float32)
    w2 = 0.1 * jax.random.normal(kw2, (out_ch, C), dtype=jnp.float32)
    b2 = 0.1 * jax.random.normal(kb2, (C,), dtype=jnp.float32)
    return w1, w2, b2


def _run_case(key, B, C, out_ch, hw_x, hw_e, dtype, atol):
    kx, ke, kp = jax.random.split(key, 3)
    x = jax.random.normal(kx, (B, C) + hw_x, dtype=jnp.float32).astype(dtype)
    e = jax.random.normal(ke, (B, C) + hw_e, dtype=jnp.float32).astype(dtype)
    w1, w2, b2 = _make_params(kp, C, out_ch)

    out = secat_forward(x, e, w1, w2, b2)
    jax.block_until_ready(out)

    assert out.shape == x.shape and out.dtype == x.dtype
    ref = secat_reference(x.astype(jnp.float32), e.astype(jnp.float32), w1, w2, b2)
    assert jnp.allclose(out.astype(jnp.float32), ref, atol=atol, rtol=1e-4), (
        f"mismatch (B={B}, C={C}, hw_x={hw_x}, hw_e={hw_e}, dtype={dtype})")


if __name__ == "__main__":
    root = jax.random.PRNGKey(0)
    k1, k2, k3 = jax.random.split(root, 3)

    # 1) Primary small demo: fused two-input pool, single spatial block.
    _run_case(k1, B=2, C=4, out_ch=8, hw_x=(16, 16), hw_e=(16, 16),
              dtype=jnp.float32, atol=1e-5)
    # 2) Different spatial sizes (separate pool calls) + ragged last spatial
    #    block (in-kernel lane-mask path, no jnp.pad).
    _run_case(k2, B=2, C=8, out_ch=8, hw_x=(100, 100), hw_e=(52, 52),
              dtype=jnp.float32, atol=1e-5)
    # 3) bf16 activations + the 2-way spatial "parallel" split path
    #    (one row block, 4 spatial blocks) + output dtype parity.
    _run_case(k3, B=2, C=16, out_ch=8, hw_x=(128, 128), hw_e=(128, 128),
              dtype=jnp.bfloat16, atol=2e-2)

    print("KERNEL_OK")
</pallas_src>

<mosaic_0001>
module attributes {stable_mosaic.version = 11 : i64} {
  func.func @kernel(%arg0: i32, %arg1: i32, %arg2: i32, %arg3: memref<8x256xf32, #tpu.memory_space<vmem>>, %arg4: memref<8x256xf32, #tpu.memory_space<vmem>>, %arg5: memref<1x8x128xf32, #tpu.memory_space<vmem>>, %arg6: memref<1x8x128xf32, #tpu.memory_space<vmem>>) attributes {dimension_semantics = [#tpu.dimension_semantics<parallel>, #tpu.dimension_semantics<parallel>, #tpu.dimension_semantics<arbitrary>], iteration_bounds = array<i64: 1, 1, 1>, scalar_prefetch = 0 : i64, scratch_operands = 0 : i64, tpu.core_type = #tpu.core_type<tc>, window_params = [{transform_indices = @transform_0, window_bounds = array<i64: 8, 256>}, {transform_indices = @transform_1, window_bounds = array<i64: 8, 256>}, {transform_indices = @transform_2, window_bounds = array<i64: 1, 8, 128>}, {transform_indices = @transform_3, window_bounds = array<i64: 1, 8, 128>}]} {
    %c0_i32 = arith.constant 0 : i32
    %0 = arith.cmpi eq, %arg2, %c0_i32 : i32
    %1 = arith.extui %0 : i1 to i32
    %c0_i32_0 = arith.constant 0 : i32
    %2 = arith.cmpi ne, %1, %c0_i32_0 : i32
    scf.if %2 {
      %cst = arith.constant 0.000000e+00 : f32
      %21 = vector.broadcast %cst : f32 to vector<8x128xf32>
      %c0_19 = arith.constant 0 : index
      %c0_20 = arith.constant 0 : index
      %c0_21 = arith.constant 0 : index
      %22 = vector.load %arg5[%c0_19, %c0_20, %c0_21] : memref<1x8x128xf32, #tpu.memory_space<vmem>>, vector<1x8x128xf32>
      %23 = vector.shape_cast %22 : vector<1x8x128xf32> to vector<8x128xf32>
      %24 = vector.shape_cast %21 : vector<8x128xf32> to vector<1x8x128xf32>
      tpu.vector_store %arg5[%c0_19, %c0_20, %c0_21], %24 {strides = array<i32>} : memref<1x8x128xf32, #tpu.memory_space<vmem>>, vector<1x8x128xf32>,
      %cst_22 = arith.constant 0.000000e+00 : f32
      %25 = vector.broadcast %cst_22 : f32 to vector<8x128xf32>
      %c0_23 = arith.constant 0 : index
      %c0_24 = arith.constant 0 : index
      %c0_25 = arith.constant 0 : index
      %26 = vector.load %arg6[%c0_23, %c0_24, %c0_25] : memref<1x8x128xf32, #tpu.memory_space<vmem>>, vector<1x8x128xf32>
      %27 = vector.shape_cast %26 : vector<1x8x128xf32> to vector<8x128xf32>
      %28 = vector.shape_cast %25 : vector<8x128xf32> to vector<1x8x128xf32>
      tpu.vector_store %arg6[%c0_23, %c0_24, %c0_25], %28 {strides = array<i32>} : memref<1x8x128xf32, #tpu.memory_space<vmem>>, vector<1x8x128xf32>,
    } else {
    }
    %c0 = arith.constant 0 : index
    %c0_1 = arith.constant 0 : index
    %c0_2 = arith.constant 0 : index
    %3 = vector.load %arg5[%c0, %c0_1, %c0_2] : memref<1x8x128xf32, #tpu.memory_space<vmem>>, vector<1x8x128xf32>
    %4 = vector.shape_cast %3 : vector<1x8x128xf32> to vector<8x128xf32>
    %c0_3 = arith.constant 0 : index
    %c0_4 = arith.constant 0 : index
    %5 = vector.load %arg3[%c0_3, %c0_4] : memref<8x256xf32, #tpu.memory_space<vmem>>, vector<8x128xf32>
    %6 = arith.addf %4, %5 : vector<8x128xf32>
    %c0_5 = arith.constant 0 : index
    %c128 = arith.constant 128 : index
    %7 = vector.load %arg3[%c0_5, %c128] : memref<8x256xf32, #tpu.memory_space<vmem>>, vector<8x128xf32>
    %8 = arith.addf %6, %7 : vector<8x128xf32>
    %c0_6 = arith.constant 0 : index
    %c0_7 = arith.constant 0 : index
    %c0_8 = arith.constant 0 : index
    %9 = vector.load %arg5[%c0_6, %c0_7, %c0_8] : memref<1x8x128xf32, #tpu.memory_space<vmem>>, vector<1x8x128xf32>
    %10 = vector.shape_cast %9 : vector<1x8x128xf32> to vector<8x128xf32>
    %11 = vector.shape_cast %8 : vector<8x128xf32> to vector<1x8x128xf32>
    tpu.vector_store %arg5[%c0_6, %c0_7, %c0_8], %11 {strides = array<i32>} : memref<1x8x128xf32, #tpu.memory_space<vmem>>, vector<1x8x128xf32>,
    %c0_9 = arith.constant 0 : index
    %c0_10 = arith.constant 0 : index
    %c0_11 = arith.constant 0 : index
    %12 = vector.load %arg6[%c0_9, %c0_10, %c0_11] : memref<1x8x128xf32, #tpu.memory_space<vmem>>, vector<1x8x128xf32>
    %13 = vector.shape_cast %12 : vector<1x8x128xf32> to vector<8x128xf32>
    %c0_12 = arith.constant 0 : index
    %c0_13 = arith.constant 0 : index
    %14 = vector.load %arg4[%c0_12, %c0_13] : memref<8x256xf32, #tpu.memory_space<vmem>>, vector<8x128xf32>
    %15 = arith.addf %13, %14 : vector<8x128xf32>
    %c0_14 = arith.constant 0 : index
    %c128_15 = arith.constant 128 : index
    %16 = vector.load %arg4[%c0_14, %c128_15] : memref<8x256xf32, #tpu.memory_space<vmem>>, vector<8x128xf32>
    %17 = arith.addf %15, %16 : vector<8x128xf32>
    %c0_16 = arith.constant 0 : index
    %c0_17 = arith.constant 0 : index
    %c0_18 = arith.constant 0 : index
    %18 = vector.load %arg6[%c0_16, %c0_17, %c0_18] : memref<1x8x128xf32, #tpu.memory_space<vmem>>, vector<1x8x128xf32>
    %19 = vector.shape_cast %18 : vector<1x8x128xf32> to vector<8x128xf32>
    %20 = vector.shape_cast %17 : vector<8x128xf32> to vector<1x8x128xf32>
    tpu.vector_store %arg6[%c0_16, %c0_17, %c0_18], %20 {strides = array<i32>} : memref<1x8x128xf32, #tpu.memory_space<vmem>>, vector<1x8x128xf32>,
    return
  }
  func.func @transform_0(%arg0: i32, %arg1: i32, %arg2: i32) -> (i32, i32) {
    %c1_i32 = arith.constant 1 : i32
    %0 = arith.muli %arg0, %c1_i32 : i32
    %1 = arith.addi %0, %arg2 : i32
    %c0_i32 = arith.constant 0 : i32
    return %arg1, %1 : i32, i32
  }
  func.func @transform_1(%arg0: i32, %arg1: i32, %arg2: i32) -> (i32, i32) {
    %c1_i32 = arith.constant 1 : i32
    %0 = arith.muli %arg0, %c1_i32 : i32
    %1 = arith.addi %0, %arg2 : i32
    %c0_i32 = arith.constant 0 : i32
    return %arg1, %1 : i32, i32
  }
  func.func @transform_2(%arg0: i32, %arg1: i32, %arg2: i32) -> (i32, i32, i32) {
    %c0_i32 = arith.constant 0 : i32
    %c0_i32_0 = arith.constant 0 : i32
    return %arg0, %arg1, %c0_i32 : i32, i32, i32
  }
  func.func @transform_3(%arg0: i32, %arg1: i32, %arg2: i32) -> (i32, i32, i32) {
    %c0_i32 = arith.constant 0 : i32
    %c0_i32_0 = arith.constant 0 : i32
    return %arg0, %arg1, %c0_i32 : i32, i32, i32
  }
}

</mosaic_0001>

<bundles_post_ra>
// kernel: tpu_custom_call.1
= control target key start
LH: loop header
LB: loop body
LE: loop exit
PB: predicated region body
PF: predicated region fallthrough
CT: control target
= control target key end

     0   :  { %9 = vsyncpa [#allocation3], 0  ;;  %s272_s0 = inlined_call_operand.hbm [shape: f32[8,256], index: 0, kind: input, shape index: {}]   ;;  %s273_s1 = inlined_call_operand.hbm [shape: f32[8,256], index: 1, kind: input, shape index: {}]   ;;  %s274_s2 = inlined_call_operand.hbm [shape: f32[1,8,128], index: 2, kind: output, shape index: {0}]   ;;  %s275_s3 = inlined_call_operand.hbm [shape: f32[1,8,128], index: 3, kind: output, shape index: {1}]  }
   0x1   :  { %10 = vsyncpa [#allocation6], 0 }
   0x2   :  { %11 = vsyncpa [#allocation4], 0 }
   0x3   :  { %12 = vsyncpa [#allocation9], 0  ;;  %s200_s12 = smov [#allocation2]   ;;  %s201_s14 = smov [#allocation5]  }
   0x4   :  { %s23_s13 = sshll.u32 %s200_s12, 4  ;;  %s37_s15 = sshll.u32 %s201_s14, 4  ;;  %s24_s13 = int_to_ptr.vmem [resolvable:$true] %s23_s13  ;;  %s38_s15 = int_to_ptr.vmem [resolvable:$true] %s37_s15 }
   0x5   :  { %s104_s18 = scalar_lea.hbm %s272_s0, 256 }
   0x6   :  { %p105_p0 = scmp.ne.s32.totalorder %s272_s0, %s104_s18  ;;  %p108_p1 = scmp.lt.u32.totalorder %s104_s18, %s272_s0 }
   0x8   :  { %p110_p2 = pnand %p108_p1, %p105_p0 }
   0xa   :  { %113 = shalt.err (!%p110_p2)
}
   0xb   :  { %s114_s23 = scalar_lea.vmem %s24_s13, 256  ;;  %p119_p4 = scmp.lt.s32.totalorder %s24_s13, %s24_s13 }
   0xc   :  { %p115_p3 = scmp.ne.s32.totalorder %s24_s13, %s114_s23  ;;  %p120_p5 = scmp.lt.s32.totalorder %s114_s23, %s114_s23 }
   0xe   :  { %p121_p6 = por %p120_p5, %p119_p4 }
  0x10   :  { %p122_p7 = pnand %p121_p6, %p115_p3 }
  0x12   :  { %125 = shalt.err (!%p122_p7)
}
  0x13   :  { %26 = dma.hbm_to_vmem [thread:$0]  %s272_s0, 256, %s24_s13, [#allocation3]  }
  0x14   :  { %s126_s28 = scalar_lea.hbm %s273_s1, 256 }
  0x15   :  { %p127_p8 = scmp.ne.s32.totalorder %s273_s1, %s126_s28  ;;  %p130_p9 = scmp.lt.u32.totalorder %s126_s28, %s273_s1 }
  0x17   :  { %p132_p10 = pnand %p130_p9, %p127_p8 }
  0x19   :  { %135 = shalt.err (!%p132_p10)
}
  0x1a   :  { %s136_s6 = scalar_lea.vmem %s38_s15, 256  ;;  %p141_p12 = scmp.lt.s32.totalorder %s38_s15, %s38_s15 }
  0x1b   :  { %p137_p11 = scmp.ne.s32.totalorder %s38_s15, %s136_s6  ;;  %p142_p13 = scmp.lt.s32.totalorder %s136_s6, %s136_s6 }
  0x1d   :  { %p143_p0 = por %p142_p13, %p141_p12 }
  0x1f   :  { %p144_p1 = pnand %p143_p0, %p137_p11 }
  0x21   :  { %147 = shalt.err (!%p144_p1)
}
  0x22   :  { %40 = dma.hbm_to_vmem [thread:$0]  %s273_s1, 256, %s38_s15, [#allocation6]  }
  0x23   :  { %192 = dma.done.wait [#allocation3], 256  }
  0x24   :  { %193 = vsyncadd [#allocation3], 4294967040 }
  0x25   :  { %194 = dma.done.wait [#allocation6], 256  }
  0x26   :  { %195 = vsyncadd [#allocation6], 4294967040  ;;  %v58_v0 = vld [vmem:[#allocation2] sm:$0xff]  ;;  %v60_v1 = vld [vmem:[#allocation2 + $0x8] sm:$0xff]  ;;  %s202_s8 = smov [#allocation7]   ;;  %s203_s10 = smov [#allocation8]  }
  0x27   :  { %v64_v2 = vld [vmem:[#allocation5] sm:$0xff]  ;;  %s75_s9 = sshll.u32 %s202_s8, 4  ;;  %v66_v3 = vld [vmem:[#allocation5 + $0x8] sm:$0xff]  ;;  %s85_s11 = sshll.u32 %s203_s10, 4  ;;  %v61_v4 = vadd.f32 %v60_v1, %v58_v0  ;;  %s76_s9 = int_to_ptr.vmem [resolvable:$true] %s75_s9  ;;  %s86_s11 = int_to_ptr.vmem [resolvable:$true] %s85_s11 }
  0x28   :  { %v67_v5 = vadd.f32 %v66_v3, %v64_v2  ;;  %s148_s12 = scalar_lea.vmem %s76_s9, 128  ;;  %p153_p3 = scmp.lt.s32.totalorder %s76_s9, %s76_s9 }
  0x29   :  { %62 = vst [vmem:[#allocation7] sm:$0xff] %v61_v4  ;;  %p149_p2 = scmp.ne.s32.totalorder %s76_s9, %s148_s12  ;;  %p154_p4 = scmp.lt.s32.totalorder %s148_s12, %s148_s12 }
  0x2a   :  { %68 = vst [vmem:[#allocation8] sm:$0xff] %v67_v5 }
  0x2b   :  { %p155_p5 = por %p154_p4, %p153_p3 }
  0x2d   :  { %p156_p6 = pnand %p155_p5, %p149_p2 }
  0x2f   :  { %159 = shalt.err (!%p156_p6)
}
  0x30   :  { %s160_s14 = scalar_lea.hbm %s274_s2, 128 }
  0x31   :  { %p161_p7 = scmp.ne.s32.totalorder %s274_s2, %s160_s14  ;;  %p164_p8 = scmp.lt.u32.totalorder %s160_s14, %s274_s2 }
  0x33   :  { %p166_p9 = pnand %p164_p8, %p161_p7 }
  0x35   :  { %169 = shalt.err (!%p166_p9)
}
  0x36   :  { %78 = dma.vmem_to_hbm [thread:$0]  %s76_s9, 128, %s274_s2, [#allocation4]  }
  0x37   :  { %s170_s21 = scalar_lea.vmem %s86_s11, 128  ;;  %p175_p11 = scmp.lt.s32.totalorder %s86_s11, %s86_s11 }
  0x38   :  { %p171_p10 = scmp.ne.s32.totalorder %s86_s11, %s170_s21  ;;  %p176_p12 = scmp.lt.s32.totalorder %s170_s21, %s170_s21 }
  0x3a   :  { %p177_p13 = por %p176_p12, %p175_p11 }
  0x3c   :  { %p178_p0 = pnand %p177_p13, %p171_p10 }
  0x3e   :  { %181 = shalt.err (!%p178_p0)
}
  0x3f   :  { %s182_s24 = scalar_lea.hbm %s275_s3, 128 }
  0x40   :  { %p183_p1 = scmp.ne.s32.totalorder %s275_s3, %s182_s24  ;;  %p186_p2 = scmp.lt.u32.totalorder %s182_s24, %s275_s3 }
  0x42   :  { %p188_p3 = pnand %p186_p2, %p183_p1 }
  0x44   :  { %191 = shalt.err (!%p188_p3)
}
  0x45   :  { %88 = dma.vmem_to_hbm [thread:$0]  %s86_s11, 128, %s275_s3, [#allocation9]  }
  0x46   :  { %196 = dma.done.wait [#allocation4], 128  }
  0x47   :  { %197 = vsyncadd [#allocation4], 4294967168 }
  0x48   :  { %198 = dma.done.wait [#allocation9], 128  }
  0x49   :  { %199 = vsyncadd [#allocation9], 4294967168 }
  0x4a   :  { %95 = vsyncpa [#allocation3], 1 }
  0x4b   :  { %96 = vsyncpa [#allocation6], 1 }
  0x4c   :  { %97 = vsyncpa [#allocation4], 1 }
  0x4d   :  { %98 = vsyncpa [#allocation9], 1 }

</bundles_post_ra>
